<compile_context>
chip_gen: v5e
topology: v5e:2x2
jax: 0.10.0
libtpu: 0.0.40
codegen_flags: <defaults>
</compile_context>

<pallas_src>
import jax
import jax.numpy as jnp
from jax.experimental import pallas as pl
from jax.experimental.pallas import tpu as pltpu


# ---------------------------------------------------------------------------
# Kernels
# ---------------------------------------------------------------------------

def _natural_kernel(x_ref, w_ref, b_ref, o_ref):
    """Y[tile_b, channels] = X[tile_b, coords] @ W[coords, channels] + b."""
    y = jnp.dot(x_ref[...], w_ref[...], preferred_element_type=jnp.float32)
    o_ref[...] = (y + b_ref[...]).astype(o_ref.dtype)


def _make_transposed_kernel(coords: int, use_vpu: bool):
    """Batch-on-lanes kernels for channels < 128 (keep stores lane-dense)."""
    if use_vpu:
        # Tiny contraction: the MXU would be <1% utilized — unrolled VPU madd
        # with the batch dimension on the 128-lane axis.
        def kernel(xT_ref, wT_ref, b_ref, oT_ref):
            w = wT_ref[...].astype(jnp.float32)              # (channels, coords)
            acc = jnp.broadcast_to(b_ref[...], oT_ref.shape).astype(jnp.float32)
            for k in range(coords):                          # static unroll (tiny)
                acc = acc + w[:, k:k + 1] * xT_ref[pl.ds(k, 1), :].astype(jnp.float32)
            oT_ref[...] = acc.astype(oT_ref.dtype)
    else:
        def kernel(xT_ref, wT_ref, b_ref, oT_ref):
            y = jnp.dot(wT_ref[...], xT_ref[...],
                        preferred_element_type=jnp.float32)
            oT_ref[...] = (y + b_ref[...]).astype(oT_ref.dtype)
    return kernel


# ---------------------------------------------------------------------------
# Device-aware tiling
# ---------------------------------------------------------------------------

def _device_vmem_bytes() -> int:
    try:
        return int(pltpu.get_tpu_info().vmem_capacity_bytes)
    except Exception:
        return 128 * 1024 * 1024        # conservative v5e/v6e default


def _round_up(n: int, m: int) -> int:
    return -(-n // m) * m


def _pick_tile_b(batch, coords, channels, dtype_bytes, *, natural,
                 vmem_budget, min_steps):
    """Batch tile sized by HBM bytes per grid step, lane-aligned, VMEM-checked."""
    if batch <= 256:
        return batch                                         # single small tile
    # ~2 MiB of (X tile + Y tile) HBM traffic per grid step amortizes the
    # ~0.35 us fixed per-step cost.
    hbm_per_row = (coords + channels) * dtype_bytes
    tile = (2 * 1024 * 1024 + hbm_per_row - 1) // hbm_per_row
    # VMEM footprint per row (padded VMEM tiles, double-buffered X and Y).
    if natural:
        pad_in, pad_out = _round_up(coords, 128), _round_up(channels, 128)
    else:
        pad_in, pad_out = _round_up(coords, 8), _round_up(channels, 8)
    vmem_per_row = 2 * (pad_in + pad_out) * dtype_bytes
    max_rows = max(128, vmem_budget // vmem_per_row)
    tile = min(tile, max_rows, 32768, batch)
    tile = max(128, (tile // 128) * 128)                     # lane-aligned
    # Dual-TensorCore (v7x-class) chips: keep >= min_steps grid steps so each
    # core still has >= 2 steps to pipeline — only when the batch is large.
    if min_steps > 1 and batch >= min_steps * 256:
        while pl.cdiv(batch, tile) < min_steps and tile > 128:
            tile = max(128, ((tile // 2) // 128) * 128)
    return int(tile)


# ---------------------------------------------------------------------------
# Forward
# ---------------------------------------------------------------------------

def field_forward(x, w, b):
    """Affine Field forward: [batch, coords] -> [batch, channels]."""
    batch, coords = x.shape
    coords_w, channels = w.shape
    assert coords == coords_w

    dtype_bytes = jnp.dtype(x.dtype).itemsize
    # Cast the (tiny) weight to the activation dtype so the MXU runs natively
    # (e.g. bf16 x bf16 -> f32); bias stays f32 for the accumulator add.
    w = w.astype(x.dtype)
    b_f32 = b.astype(jnp.float32)

    vmem_cap = _device_vmem_bytes()
    dual_core = vmem_cap <= 64 * 1024 * 1024          # v7x-class: 64 MiB VMEM, 2 TCs
    vmem_limit = 32 * 1024 * 1024 if dual_core else 64 * 1024 * 1024
    vmem_budget = (vmem_limit * 3) // 4               # headroom under the scoped limit
    min_steps = 4 if dual_core else 1

    natural = channels >= 128
    tile_b = _pick_tile_b(batch, coords, channels, dtype_bytes,
                          natural=natural, vmem_budget=vmem_budget,
                          min_steps=min_steps)
    grid = (pl.cdiv(batch, tile_b),)

    cost = pl.CostEstimate(
        flops=2 * batch * coords * channels,
        transcendentals=0,
        bytes_accessed=dtype_bytes * (batch * coords + coords * channels
                                      + batch * channels) + 4 * channels,
    )
    cparams = pltpu.CompilerParams(
        dimension_semantics=("parallel",),
        vmem_limit_bytes=vmem_limit,
    )

    if natural:
        # Natural orientation: no wrapper transposes, HBM traffic = X + Y.
        b_row = b_f32.reshape(1, channels)                   # lane-dense bias row
        return pl.pallas_call(
            _natural_kernel,
            out_shape=jax.ShapeDtypeStruct((batch, channels), x.dtype),
            grid_spec=pltpu.PrefetchScalarGridSpec(
                num_scalar_prefetch=0,
                grid=grid,
                in_specs=[
                    pl.BlockSpec((tile_b, coords), lambda i: (i, 0)),    # X tile
                    pl.BlockSpec((coords, channels), lambda i: (0, 0)),  # W (resident)
                    pl.BlockSpec((1, channels), lambda i: (0, 0)),       # bias row
                ],
                out_specs=pl.BlockSpec((tile_b, channels), lambda i: (i, 0)),
            ),
            compiler_params=cparams,
            cost_estimate=cost,
        )(x, w, b_row)

    # channels < 128: keep batch on the lane axis so stores stay lane-dense.
    # (Wrapper transposes are layout plumbing; X/Y are small in this regime.)
    xT = x.T                                                 # (coords, batch)
    wT = w.T                                                 # (channels, coords)
    b_col = b_f32.reshape(channels, 1)
    use_vpu = (coords <= 16) and (channels <= 32)
    kernel = _make_transposed_kernel(coords, use_vpu)
    yT = pl.pallas_call(
        kernel,
        out_shape=jax.ShapeDtypeStruct((channels, batch), x.dtype),
        grid_spec=pltpu.PrefetchScalarGridSpec(
            num_scalar_prefetch=0,
            grid=grid,
            in_specs=[
                pl.BlockSpec((coords, tile_b), lambda i: (0, i)),      # X^T tile
                pl.BlockSpec((channels, coords), lambda i: (0, 0)),    # W^T (resident)
                pl.BlockSpec((channels, 1), lambda i: (0, 0)),         # bias column
            ],
            out_specs=pl.BlockSpec((channels, tile_b), lambda i: (0, i)),
        ),
        compiler_params=cparams,
        cost_estimate=cost,
    )(xT, wT, b_col)
    return yT.T                                              # (batch, channels)


class PallasField:
    """Concrete Field(coords, channels): deterministic affine map Y = X W + b."""

    def __init__(self, coords: int, channels: int, key=None):
        self.coords = int(coords)
        self.channels = int(channels)
        if key is None:
            key = jax.random.PRNGKey(0)
        kw, kb = jax.random.split(key)
        # Deterministic synthetic parameter init (no checkpoint load).
        self.w = jax.random.normal(kw, (self.coords, self.channels),
                                   dtype=jnp.float32) * (self.coords ** -0.5)
        self.b = jax.random.normal(kb, (self.channels,), dtype=jnp.float32) * 0.01
        self._fwd = jax.jit(field_forward)   # fuse layout ops + pallas_call

    def __call__(self, x):
        assert x.ndim == 2 and x.shape[1] == self.coords
        return self._fwd(x, self.w, self.b)


if __name__ == "__main__":
    key = jax.random.PRNGKey(0)
    kx1, kx2, kx3, kp1, kp2 = jax.random.split(key, 5)

    # Case 1: tiny Field (coords=4, channels=8) -> batch-on-lanes VPU path.
    f_small = PallasField(4, 8, key=kp1)
    x1 = jax.random.normal(kx1, (8, 4), dtype=jnp.float32)
    y1 = jax.block_until_ready(f_small(x1))
    ref1 = x1 @ f_small.w + f_small.b
    assert y1.shape == (8, 8)
    assert jnp.allclose(y1, ref1, atol=1e-5, rtol=1e-5)

    # Case 2: multi-step grid with a partial last tile (300 rows, tile 256).
    x2 = jax.random.normal(kx2, (300, 4), dtype=jnp.float32)
    y2 = jax.block_until_ready(f_small(x2))
    ref2 = x2 @ f_small.w + f_small.b
    assert y2.shape == (300, 8)
    assert jnp.allclose(y2, ref2, atol=1e-5, rtol=1e-5)

    # Case 3: channels=128 -> natural-layout MXU path (no wrapper transposes).
    f_wide = PallasField(32, 128, key=kp2)
    x3 = jax.random.normal(kx3, (512, 32), dtype=jnp.float32)
    y3 = jax.block_until_ready(f_wide(x3))
    ref3 = x3 @ f_wide.w + f_wide.b
    assert y3.shape == (512, 128)
    assert jnp.allclose(y3, ref3, atol=1e-3, rtol=1e-3)

    print("KERNEL_OK")
</pallas_src>

<mosaic_0001>
module attributes {stable_mosaic.version = 11 : i64} {
  func.func @kernel(%arg0: i32, %arg1: memref<4x8xf32, #tpu.memory_space<vmem>>, %arg2: memref<8x4xf32, #tpu.memory_space<vmem>>, %arg3: memref<8x1xf32, #tpu.memory_space<vmem>>, %arg4: memref<8x8xf32, #tpu.memory_space<vmem>>) attributes {dimension_semantics = [#tpu.dimension_semantics<parallel>], iteration_bounds = array<i64: 1>, scalar_prefetch = 0 : i64, scratch_operands = 0 : i64, tpu.core_type = #tpu.core_type<tc>, window_params = [{transform_indices = @transform_0, window_bounds = array<i64: 4, 8>}, {pipeline_mode = #tpu.pipeline_mode<synchronous>, transform_indices = @transform_1, window_bounds = array<i64: 8, 4>}, {pipeline_mode = #tpu.pipeline_mode<synchronous>, transform_indices = @transform_2, window_bounds = array<i64: 8, 1>}, {transform_indices = @transform_3, window_bounds = array<i64: 8, 8>}]} {
    %c0 = arith.constant 0 : index
    %c0_0 = arith.constant 0 : index
    %0 = vector.load %arg2[%c0, %c0_0] : memref<8x4xf32, #tpu.memory_space<vmem>>, vector<8x4xf32>
    %c0_1 = arith.constant 0 : index
    %c0_2 = arith.constant 0 : index
    %1 = vector.load %arg3[%c0_1, %c0_2] : memref<8x1xf32, #tpu.memory_space<vmem>>, vector<8x1xf32>
    %2 = vector.shape_cast %1 : vector<8x1xf32> to vector<8x1xf32>
    %3 = vector.broadcast %2 : vector<8x1xf32> to vector<8x8xf32>
    %4 = vector.extract_strided_slice %0 {offsets = [0, 0], sizes = [8, 1], strides = [1, 1]} : vector<8x4xf32> to vector<8x1xf32>
    %c0_3 = arith.constant 0 : index
    %c0_4 = arith.constant 0 : index
    %5 = vector.load %arg1[%c0_3, %c0_4] : memref<4x8xf32, #tpu.memory_space<vmem>>, vector<1x8xf32>
    %6 = vector.broadcast %4 : vector<8x1xf32> to vector<8x8xf32>
    %7 = vector.broadcast %5 : vector<1x8xf32> to vector<8x8xf32>
    %8 = arith.mulf %6, %7 : vector<8x8xf32>
    %9 = arith.addf %3, %8 : vector<8x8xf32>
    %10 = vector.extract_strided_slice %0 {offsets = [0, 1], sizes = [8, 1], strides = [1, 1]} : vector<8x4xf32> to vector<8x1xf32>
    %c1 = arith.constant 1 : index
    %c0_5 = arith.constant 0 : index
    %11 = vector.load %arg1[%c1, %c0_5] : memref<4x8xf32, #tpu.memory_space<vmem>>, vector<1x8xf32>
    %12 = vector.broadcast %10 : vector<8x1xf32> to vector<8x8xf32>
    %13 = vector.broadcast %11 : vector<1x8xf32> to vector<8x8xf32>
    %14 = arith.mulf %12, %13 : vector<8x8xf32>
    %15 = arith.addf %9, %14 : vector<8x8xf32>
    %16 = vector.extract_strided_slice %0 {offsets = [0, 2], sizes = [8, 1], strides = [1, 1]} : vector<8x4xf32> to vector<8x1xf32>
    %c2 = arith.constant 2 : index
    %c0_6 = arith.constant 0 : index
    %17 = vector.load %arg1[%c2, %c0_6] : memref<4x8xf32, #tpu.memory_space<vmem>>, vector<1x8xf32>
    %18 = vector.broadcast %16 : vector<8x1xf32> to vector<8x8xf32>
    %19 = vector.broadcast %17 : vector<1x8xf32> to vector<8x8xf32>
    %20 = arith.mulf %18, %19 : vector<8x8xf32>
    %21 = arith.addf %15, %20 : vector<8x8xf32>
    %22 = vector.extract_strided_slice %0 {offsets = [0, 3], sizes = [8, 1], strides = [1, 1]} : vector<8x4xf32> to vector<8x1xf32>
    %c3 = arith.constant 3 : index
    %c0_7 = arith.constant 0 : index
    %23 = vector.load %arg1[%c3, %c0_7] : memref<4x8xf32, #tpu.memory_space<vmem>>, vector<1x8xf32>
    %24 = vector.broadcast %22 : vector<8x1xf32> to vector<8x8xf32>
    %25 = vector.broadcast %23 : vector<1x8xf32> to vector<8x8xf32>
    %26 = arith.mulf %24, %25 : vector<8x8xf32>
    %27 = arith.addf %21, %26 : vector<8x8xf32>
    %c0_8 = arith.constant 0 : index
    %c0_9 = arith.constant 0 : index
    %28 = vector.load %arg4[%c0_8, %c0_9] : memref<8x8xf32, #tpu.memory_space<vmem>>, vector<8x8xf32>
    tpu.vector_store %arg4[%c0_8, %c0_9], %27 {strides = array<i32>} : memref<8x8xf32, #tpu.memory_space<vmem>>, vector<8x8xf32>,
    return
  }
  func.func @transform_0(%arg0: i32) -> (i32, i32) {
    %c0_i32 = arith.constant 0 : i32
    %c0_i32_0 = arith.constant 0 : i32
    return %c0_i32, %arg0 : i32, i32
  }
  func.func @transform_1(%arg0: i32) -> (i32, i32) {
    %c0_i32 = arith.constant 0 : i32
    %c0_i32_0 = arith.constant 0 : i32
    %c0_i32_1 = arith.constant 0 : i32
    return %c0_i32, %c0_i32_0 : i32, i32
  }
  func.func @transform_2(%arg0: i32) -> (i32, i32) {
    %c0_i32 = arith.constant 0 : i32
    %c0_i32_0 = arith.constant 0 : i32
    %c0_i32_1 = arith.constant 0 : i32
    return %c0_i32, %c0_i32_0 : i32, i32
  }
  func.func @transform_3(%arg0: i32) -> (i32, i32) {
    %c0_i32 = arith.constant 0 : i32
    %c0_i32_0 = arith.constant 0 : i32
    return %c0_i32, %arg0 : i32, i32
  }
}

</mosaic_0001>

<bundles_post_ra>
// kernel: field_forward.1
= control target key start
LH: loop header
LB: loop body
LE: loop exit
PB: predicated region body
PF: predicated region fallthrough
CT: control target
= control target key end

     0   :  { %v73_v0 = vmov 0   ;;  %v74_v1 = vmov 1   ;;  %v75_v3 = vmov 3   ;;  %v76_v5 = vmov 2   ;;  %s118_s1 = inlined_call_operand.vmem [shape: f32[8,4], index: 1, kind: input, shape index: {}]   ;;  %s119_s0 = inlined_call_operand.vmem [shape: f32[4,8], index: 0, kind: input, shape index: {}]   ;;  %s120_s2 = inlined_call_operand.vmem [shape: f32[8,1], index: 2, kind: input, shape index: {}]   ;;  %s121_s3 = inlined_call_operand.vmem [shape: f32[8,8], index: 3, kind: output, shape index: {}]  }
   0x1   :  { %64 = vset.pattern.permute.xlu0 %v73_v0  ;;  %65 = vset.pattern.permute.xlu1 %v74_v1  ;;  %v14_v2 = vld [vmem:[%s118_s1] sm:$0xff]  ;;  %vm54_vm0 = vcmask 64512  }
   0x2   :  { %24 = vperm.xlu0 %64, %v14_v2   ;;  %32 = vperm.xlu1 %65, %v14_v2   ;;  %v15_v4 = vld [vmem:[%s120_s2] sm:$0xff] }
   0x3   :  { %67 = vset.pattern.permute.xlu2 %v75_v3  ;;  %v69_v8 = vld [vmem:[%s119_s0] ss:$0 sm:$0xff]  ;;  %v70_v9 = vld [vmem:[%s119_s0 + $0x1] ss:$0 sm:$0xff]  ;;  %v71_v10 = vld [vmem:[%s119_s0 + $0x2] ss:$0 sm:$0xff] }
   0x4   :  { %48 = vperm.xlu2 %67, %v14_v2   ;;  %v72_v12 = vld [vmem:[%s119_s0 + $0x3] ss:$0 sm:$0xff] }
   0xa   :  { %18 = vperm.xlu0 %64, %v15_v4   ;;  %66 = vset.pattern.permute.xlu1 %v76_v5 }
   0xb   :  { %40 = vperm.xlu1 %66, %v14_v2  }
  0x12   :  { %68 = vset.pattern.permute.xlu0 %v75_v3 }
  0x5e   :  { %v49_v14 = vpop.permute.xlu2 %48 }
  0x5f   :  { %v52_v20 = vmul.f32 %v72_v12, %v49_v14 }
  0x74   :  { %v25_v6 = vpop.permute.xlu0 %24  ;;  %v33_v7 = vpop.permute.xlu1 %32 }
  0x75   :  { %v28_v11 = vmul.f32 %v69_v8, %v25_v6  ;;  %v36_v15 = vmul.f32 %v70_v9, %v33_v7 }
  0x7c   :  { %v19_v13 = vpop.permute.xlu0 %18 }
  0x7d   :  { %v29_v16 = vadd.f32 %v28_v11, %v19_v13  ;;  %v41_v17 = vpop.permute.xlu1 %40 }
  0x7e   :  { %v44_v18 = vmul.f32 %v71_v10, %v41_v17 }
  0x7f   :  { %v37_v19 = vadd.f32 %v36_v15, %v29_v16 }
  0x81   :  { %v45_v21 = vadd.f32 %v44_v18, %v37_v19 }
  0x83   :  { %v53_v22 = vadd.f32 %v52_v20, %v45_v21 }
  0x85   :  { %55 = vst.msk [vmem:[%s121_s3] sm:$0xff] %vm54_vm0, %v53_v22 }

</bundles_post_ra>
